<compile_context>
chip_gen: v7x
topology: tpu7x:2x2x1
jax: 0.10.0
libtpu: 0.0.40
codegen_flags: <defaults>
</compile_context>

<pallas_src>
import jax
import jax.numpy as jnp
from jax.experimental import pallas as pl
from jax.experimental.pallas import tpu as pltpu


def _round_up(v, m):
    return (v + m - 1) // m * m


def _dwconv_mxu_kernel(x_ref, w_ref, b_ref, o_ref):
    # x_ref: (M_pad, Lt)     im2col'd input slab; lanes = fused (batch, time), 128-aligned
    # w_ref: (R_pad, M_pad)  block-diagonal depthwise weight (resident, fetched once)
    # b_ref: (R_pad, 1)      per-output-row bias (resident)
    # o_ref: (R_pad, Lt)     lane-dense output slab
    acc = jnp.dot(
        w_ref[...], x_ref[...],
        preferred_element_type=jnp.float32,
        precision=jax.lax.Precision.HIGHEST,
    )
    o_ref[...] = (acc + b_ref[...]).astype(o_ref.dtype)


def depthwise_conv2d(x, weight, bias):
    """EEGNet depthwise conv: Conv2d(nin, nin*kpl, kernel=[chans,1], groups=nin), VALID.

    x:      (N, nin, H, W)          NCHW
    weight: (nin*kpl, 1, chans, 1)  PyTorch OIHW (grouped, group-major out channels)
    bias:   (nin*kpl,)
    returns (N, nin*kpl, H-chans+1, W)
    """
    N, nin, H, W = x.shape
    oc, _, chans, _ = weight.shape
    kpl = oc // nin
    h_out = H - chans + 1
    R = oc * h_out          # fused output rows: (cin, k, h') -> matches PyTorch ordering
    M = nin * H             # fused contraction rows: (cin, h)

    f32 = jnp.float32
    w_r = weight.reshape(nin, kpl, chans).astype(f32)

    # ---- Build the block-diagonal / shifted ("im2col") weight in the wrapper (tiny). --
    # shifts[dh, h', h] = 1  iff  h == h' + dh   (slides the (chans,1) kernel along H)
    shifts = jnp.stack(
        [jnp.eye(h_out, H, k=dh, dtype=f32) for dh in range(chans)], axis=0)
    core = jnp.einsum("ckd,dph->ckph", w_r, shifts)                 # (nin,kpl,h_out,H)
    w_big = jnp.einsum("cq,ckph->ckpqh", jnp.eye(nin, dtype=f32), core)
    w_big = w_big.reshape(R, M)                                     # block-diagonal
    b_big = jnp.broadcast_to(bias.astype(f32)[:, None], (oc, h_out)).reshape(R, 1)

    # ---- Lane-dense input slab: (M, N*W_pad); lanes = (batch, time), 128-aligned. ----
    W_pad = _round_up(W, 128)
    x2d = jnp.transpose(x, (1, 2, 0, 3)).reshape(M, N, W).astype(f32)
    x2d = jnp.pad(x2d, ((0, 0), (0, 0), (0, W_pad - W)))
    x2d = x2d.reshape(M, N * W_pad)
    L = N * W_pad

    # ---- Alignment padding for (8,128) vreg tiling. ----
    M_pad = _round_up(M, 8)
    R_pad = _round_up(R, 8)

    # Lane tile: as large as comfortably fits double-buffered VMEM (v7x: 64 MiB phys).
    lane_tile = 2048
    while lane_tile > 128 and M_pad * lane_tile * 4 > (4 << 20):
        lane_tile //= 2
    lane_tile = min(L, lane_tile)
    L_pad = _round_up(L, lane_tile)

    x2d = jnp.pad(x2d, ((0, M_pad - M), (0, L_pad - L)))
    w_big = jnp.pad(w_big, ((0, R_pad - R), (0, M_pad - M)))
    b_big = jnp.pad(b_big, ((0, R_pad - R), (0, 0)))

    grid = (L_pad // lane_tile,)

    out2d = pl.pallas_call(
        _dwconv_mxu_kernel,
        out_shape=jax.ShapeDtypeStruct((R_pad, L_pad), x.dtype),
        grid=grid,
        in_specs=[
            pl.BlockSpec((M_pad, lane_tile), lambda j: (0, j)),   # input slab tile
            pl.BlockSpec((R_pad, M_pad), lambda j: (0, 0)),       # resident weights
            pl.BlockSpec((R_pad, 1), lambda j: (0, 0)),           # resident bias
        ],
        out_specs=pl.BlockSpec((R_pad, lane_tile), lambda j: (0, j)),
        compiler_params=pltpu.CompilerParams(
            dimension_semantics=("parallel",)),
    )(x2d, w_big, b_big)

    # (R_pad, L_pad) -> (N, nin*kpl, h_out, W)   (un-pad, un-fuse; pure layout plumbing)
    out = out2d[:R, :L].reshape(R, N, W_pad)[:, :, :W]
    out = jnp.transpose(out, (1, 0, 2)).reshape(N, oc, h_out, W)
    return out


def _reference_depthwise(x, weight, bias):
    """Plain-JAX grouped-conv reference (correctness check only)."""
    out = jax.lax.conv_general_dilated(
        x, weight,
        window_strides=(1, 1),
        padding="VALID",
        dimension_numbers=("NCHW", "OIHW", "NCHW"),
        feature_group_count=x.shape[1],
        precision=jax.lax.Precision.HIGHEST,
    )
    return out + bias[None, :, None, None]


if __name__ == "__main__":
    key = jax.random.PRNGKey(0)

    def run_case(N, nin, kpl, chans, H, T, case_key):
        kx, kw, kb = jax.random.split(case_key, 3)
        x = jax.random.normal(kx, (N, nin, H, T), dtype=jnp.float32)
        weight = jax.random.normal(kw, (nin * kpl, 1, chans, 1), dtype=jnp.float32) * 0.1
        bias = jax.random.normal(kb, (nin * kpl,), dtype=jnp.float32) * 0.1

        out = jax.block_until_ready(depthwise_conv2d(x, weight, bias))
        ref = _reference_depthwise(x, weight, bias)
        assert out.shape == ref.shape == (N, nin * kpl, H - chans + 1, T), (out.shape, ref.shape)
        assert jnp.allclose(out, ref, atol=2e-3, rtol=2e-3), float(jnp.max(jnp.abs(out - ref)))

    k1, k2 = jax.random.split(key)
    # EEGNet case: kernel spans the whole EEG-channel axis (h_out == 1).
    run_case(N=2, nin=4, kpl=2, chans=8, H=8, T=16, case_key=k1)
    # General sliding case (H > chans, h_out > 1) -- previously untested path.
    run_case(N=2, nin=4, kpl=2, chans=8, H=16, T=16, case_key=k2)

    print("KERNEL_OK")
</pallas_src>

<mosaic_0001>
module attributes {stable_mosaic.version = 11 : i64} {
  func.func @_dwconv_mxu_kernel(%arg0: i32, %arg1: memref<32x256xf32, #tpu.memory_space<vmem>>, %arg2: memref<8x32xf32, #tpu.memory_space<vmem>>, %arg3: memref<8x1xf32, #tpu.memory_space<vmem>>, %arg4: memref<8x256xf32, #tpu.memory_space<vmem>>) attributes {dimension_semantics = [#tpu.dimension_semantics<parallel>], iteration_bounds = array<i64: 1>, scalar_prefetch = 0 : i64, scratch_operands = 0 : i64, tpu.core_type = #tpu.core_type<tc>, window_params = [{transform_indices = @transform_0, window_bounds = array<i64: 32, 256>}, {pipeline_mode = #tpu.pipeline_mode<synchronous>, transform_indices = @transform_1, window_bounds = array<i64: 8, 32>}, {pipeline_mode = #tpu.pipeline_mode<synchronous>, transform_indices = @transform_2, window_bounds = array<i64: 8, 1>}, {transform_indices = @transform_3, window_bounds = array<i64: 8, 256>}]} {
    %c0 = arith.constant 0 : index
    %c0_0 = arith.constant 0 : index
    %0 = vector.load %arg2[%c0, %c0_0] : memref<8x32xf32, #tpu.memory_space<vmem>>, vector<8x32xf32>
    %c0_1 = arith.constant 0 : index
    %c0_2 = arith.constant 0 : index
    %1 = vector.load %arg1[%c0_1, %c0_2] : memref<32x256xf32, #tpu.memory_space<vmem>>, vector<32x256xf32>
    %cst = arith.constant dense<0.000000e+00> : vector<8x256xf32>
    %2 = tpu.matmul %0, %1, %cst {dimension_numbers = #tpu.dot_dimension_numbers<[1], [0], [0], [1], [0, 0, 1, 1], [], []>, precision = #tpu.contract_precision<fp32>} : vector<8x32xf32>, vector<32x256xf32>, vector<8x256xf32> -> vector<8x256xf32>
    %c0_3 = arith.constant 0 : index
    %c0_4 = arith.constant 0 : index
    %3 = vector.load %arg3[%c0_3, %c0_4] : memref<8x1xf32, #tpu.memory_space<vmem>>, vector<8x1xf32>
    %4 = vector.broadcast %3 : vector<8x1xf32> to vector<8x256xf32>
    %5 = arith.addf %2, %4 : vector<8x256xf32>
    %c0_5 = arith.constant 0 : index
    %c0_6 = arith.constant 0 : index
    %6 = vector.load %arg4[%c0_5, %c0_6] : memref<8x256xf32, #tpu.memory_space<vmem>>, vector<8x256xf32>
    tpu.vector_store %arg4[%c0_5, %c0_6], %5 {strides = array<i32>} : memref<8x256xf32, #tpu.memory_space<vmem>>, vector<8x256xf32>,
    return
  }
  func.func @transform_0(%arg0: i32) -> (i32, i32) {
    %c0_i32 = arith.constant 0 : i32
    %c0_i32_0 = arith.constant 0 : i32
    return %c0_i32, %arg0 : i32, i32
  }
  func.func @transform_1(%arg0: i32) -> (i32, i32) {
    %c0_i32 = arith.constant 0 : i32
    %c0_i32_0 = arith.constant 0 : i32
    %c0_i32_1 = arith.constant 0 : i32
    return %c0_i32, %c0_i32_0 : i32, i32
  }
  func.func @transform_2(%arg0: i32) -> (i32, i32) {
    %c0_i32 = arith.constant 0 : i32
    %c0_i32_0 = arith.constant 0 : i32
    %c0_i32_1 = arith.constant 0 : i32
    return %c0_i32, %c0_i32_0 : i32, i32
  }
  func.func @transform_3(%arg0: i32) -> (i32, i32) {
    %c0_i32 = arith.constant 0 : i32
    %c0_i32_0 = arith.constant 0 : i32
    return %c0_i32, %arg0 : i32, i32
  }
}

</mosaic_0001>

<bundles_post_ra>
// kernel: tpu_custom_call.1
= control target key start
LH: loop header
LB: loop body
LE: loop exit
PB: predicated region body
PF: predicated region fallthrough
CT: control target
= control target key end

     0   :  { %8 = vsyncpa [#allocation3], 0  ;;  %s852_s0 = inlined_call_operand.hbm [shape: f32[32,256], index: 0, kind: input, shape index: {}]   ;;  %s853_s1 = inlined_call_operand.vmem [shape: f32[8,32], index: 1, kind: input, shape index: {}]   ;;  %s854_s2 = inlined_call_operand.vmem [shape: f32[8,1], index: 2, kind: input, shape index: {}]   ;;  %s855_s3 = inlined_call_operand.hbm [shape: f32[8,256], index: 3, kind: output, shape index: {}]  }
   0x1   :  { %9 = vsyncpa [#allocation4], 0  ;;  %s723_s12 = smov [#allocation2]   ;;  %s675_s16 = scalar_lea.hbm %s852_s0, 1024 }
   0x2   :  { %s15_s13 = sshll.u32 %s723_s12, 4  ;;  %p676_p0 = scmp.ne.s32.totalorder %s852_s0, %s675_s16  ;;  %s16_s13 = int_to_ptr.vmem [resolvable:$true] %s15_s13 }
   0x3   :  { %p679_p1 = scmp.lt.u32.totalorder %s675_s16, %s852_s0 }
   0x5   :  { %p681_p2 = pnand %p679_p1, %p676_p0 }
   0x7   :  { %684 = shalt.err (!%p681_p2)
}
   0x8   :  { %s685_s21 = scalar_lea.vmem %s16_s13, 1024  ;;  %p690_p4 = scmp.lt.s32.totalorder %s16_s13, %s16_s13 }
   0x9   :  { %p686_p3 = scmp.ne.s32.totalorder %s16_s13, %s685_s21  ;;  %p691_p5 = scmp.lt.s32.totalorder %s685_s21, %s685_s21 }
   0xb   :  { %p692_p6 = por %p691_p5, %p690_p4 }
   0xd   :  { %p693_p7 = pnand %p692_p6, %p686_p3 }
   0xf   :  { %696 = shalt.err (!%p693_p7)
}
  0x10   :  { %s724_s22 = smov 256   ;;  %s725_s23 = smov 16  }
  0x11   :  { %21 = dma.hbm_to_vmem [thread:$0]  %s852_s0, 1024, %s16_s13, [#allocation3], %s724_s22, %s724_s22, %s725_s23  }
  0x12   :  { %719 = dma.done.wait [#allocation3], 1024  }
  0x13   :  { %720 = vsyncadd [#allocation3], 4294966272  ;;  %v726_v0 = vmov 0.0   ;;  %v727_v1 = vmov 0   ;;  %v31_v2 = vld [vmem:[#allocation2 + $0x8] sm:$0xff]  ;;  %v33_v3 = vld [vmem:[#allocation2 + $0x18] sm:$0xff] }
  0x14   :  { %120 = vmatprep.mubr.f32.mxu1 %v726_v0  ;;  %405 = vmatprep.mubr.f32.mxu0 %v726_v0  ;;  %v30_v4 = vld [vmem:[#allocation2] sm:$0xff]  ;;  %vm44_vm0 = vcmask 261120   ;;  %v48_v5 = vand.u32 4294901760, %v31_v2  ;;  %v52_v6 = vand.u32 4294901760, %v33_v3  ;;  %v32_v7 = vld [vmem:[#allocation2 + $0x10] sm:$0xff]  ;;  %v35_v9 = vld [vmem:[#allocation2 + $0x28] sm:$0xff] }
  0x15   :  { %674 = vset.pattern.permute.xlu0 %v727_v1  ;;  %v50_v8 = vand.u32 4294901760, %v30_v4  ;;  %v37_v10 = vld [vmem:[#allocation2 + $0x38] sm:$0xff]  ;;  %v54_v11 = vand.u32 4294901760, %v32_v7  ;;  %v56_v12 = vand.u32 4294901760, %v35_v9  ;;  %v34_v14 = vld [vmem:[#allocation2 + $0x20] sm:$0xff]  ;;  %v36_v15 = vld [vmem:[#allocation2 + $0x30] sm:$0xff] }
  0x16   :  { %v60_v13 = vand.u32 4294901760, %v37_v10  ;;  %v29_v16 = vld [vmem:[%s853_s1] sm:$0xff]  ;;  %v766_v17 = vpack.c.bf16 %v52_v6, %v48_v5  ;;  %v768_v18 = vsub.f32 %v31_v2, %v48_v5  ;;  %v770_v19 = vsub.f32 %v33_v3, %v52_v6  ;;  %s728_s1 = smov [#allocation5]  }
  0x17   :  { %v772_v20 = vsub.f32 %v30_v4, %v50_v8  ;;  %v38_v21 = vld [vmem:[%s854_s2] sm:$0xff]  ;;  %v777_v22 = vpack.c.bf16 %v54_v11, %v50_v8  ;;  %v779_v23 = vsub.f32 %v32_v7, %v54_v11  ;;  %v783_v25 = vsub.f32 %v35_v9, %v56_v12  ;;  %s599_s2 = sshll.u32 %s728_s1, 4  ;;  %s600_s2 = int_to_ptr.vmem [resolvable:$true] %s599_s2 }
  0x18   :  { %v781_v24 = vpack.c.bf16 %v60_v13, %v56_v12  ;;  %41 = vperm.xlu0 %674, %v38_v21   ;;  %609 = vmatprep.subr.bf16.mxu1 %v766_v17  ;;  %v787_v26 = vsub.f32 %v37_v10, %v60_v13  ;;  %v58_v27 = vand.u32 4294901760, %v34_v14  ;;  %v62_v28 = vand.u32 4294901760, %v36_v15  ;;  %s697_s29 = scalar_lea.vmem %s600_s2, 256  ;;  %p702_p9 = scmp.lt.s32.totalorder %s600_s2, %s600_s2 }
  0x19   :  { %633 = vmatprep.subr.bf16.mxu0 %v766_v17  ;;  %v46_v29 = vsel %vm44_vm0, %v29_v16, 0  ;;  %611 = vmatpush1.bf16.msra.mxu1 %v777_v22  ;;  %v134_v31 = vand.u32 4294901760, %v768_v18  ;;  %v146_v32 = vand.u32 4294901760, %v770_v19  ;;  %v140_v33 = vand.u32 4294901760, %v772_v20  ;;  %p698_p8 = scmp.ne.s32.totalorder %s600_s2, %s697_s29  ;;  %p703_p10 = scmp.lt.s32.totalorder %s697_s29, %s697_s29 }
  0x1a   :  { %635 = vmatpush1.bf16.msra.mxu0 %v777_v22  ;;  %v792_v30 = vand.u32 4294901760, %v46_v29  ;;  %613 = vmatprep.subr.bf16.mxu1 %v781_v24  ;;  %v799_v34 = vpack.c.bf16 %v62_v28, %v58_v27  ;;  %v801_v35 = vsub.f32 %v34_v14, %v58_v27  ;;  %v803_v36 = vsub.f32 %v36_v15, %v62_v28 }
  0x1b   :  { %637 = vmatprep.subr.bf16.mxu0 %v781_v24  ;;  %v152_v37 = vand.u32 4294901760, %v779_v23  ;;  %v135_v39 = vsub.f32 %v768_v18, %v134_v31  ;;  %v147_v40 = vsub.f32 %v770_v19, %v146_v32  ;;  %v640_v41 = vpack.c.bf16 %v146_v32, %v134_v31  ;;  %p704_p11 = por %p703_p10, %p702_p9 }
  0x1c   :  { %v122_v38 = vsub.f32 %v46_v29, %v792_v30  ;;  %v141_v42 = vsub.f32 %v772_v20, %v140_v33  ;;  %v158_v45 = vand.u32 4294901760, %v783_v25  ;;  %v170_v49 = vand.u32 4294901760, %v787_v26 }
  0x1d   :  { %v153_v43 = vsub.f32 %v779_v23, %v152_v37  ;;  %v642_v44 = vpack.c.bf16 %v152_v37, %v140_v33  ;;  %615 = vmatpush1.bf16.msra.mxu1 %v799_v34  ;;  %v136_v47 = vand.u32 4294901760, %v135_v39  ;;  %v148_v48 = vand.u32 4294901760, %v147_v40  ;;  %p705_p12 = pnand %p704_p11, %p698_p8 }
  0x1e   :  { %639 = vmatpush1.bf16.msra.mxu0 %v799_v34  ;;  %v123_v46 = vand.u32 4294901760, %v122_v38  ;;  %v142_v50 = vand.u32 4294901760, %v141_v42  ;;  %v159_v52 = vsub.f32 %v783_v25, %v158_v45  ;;  %v164_v53 = vand.u32 4294901760, %v801_v35 }
  0x1f   :  { %641 = vmatprep.subr.bf16.mxu0 %v640_v41  ;;  %v154_v51 = vand.u32 4294901760, %v153_v43  ;;  %v616_v55 = vpack.c.bf16 %v148_v48, %v136_v47  ;;  %v171_v56 = vsub.f32 %v787_v26, %v170_v49  ;;  %v644_v57 = vpack.c.bf16 %v170_v49, %v158_v45 }
  0x20   :  { %v124_v54 = vsub.f32 %v122_v38, %v123_v46  ;;  %v160_v59 = vand.u32 4294901760, %v159_v52  ;;  %v165_v60 = vsub.f32 %v801_v35, %v164_v53  ;;  %v176_v61 = vand.u32 4294901760, %v803_v36 }
  0x21   :  { %409 = vmatmul.mubr.f32.vlgmr.msra.gmra.mrb[0].mxu0 %v123_v46  ;;  %v618_v58 = vpack.c.bf16 %v154_v51, %v142_v50  ;;  %617 = vmatprep.subr.bf16.mxu1 %v616_v55  ;;  %v172_v63 = vand.u32 4294901760, %v171_v56  ;;  %v624_v6 = vpack.c.bf16 %v770_v19, %v768_v18  ;;  %v626_v8 = vpack.c.bf16 %v779_v23, %v772_v20 }
  0x22   :  { %v125_v62 = vand.u32 4294901760, %v124_v54  ;;  %643 = vmatpush1.bf16.msra.mxu0 %v642_v44  ;;  %v166_v1 = vand.u32 4294901760, %v165_v60  ;;  %v177_v2 = vsub.f32 %v803_v36, %v176_v61  ;;  %v646_v3 = vpack.c.bf16 %v176_v61, %v164_v53  ;;  %503 = vmatprep.mubr.f32.mxu0 %v726_v0 }
  0x23   :  { %645 = vmatprep.subr.bf16.mxu0 %v644_v57  ;;  %v620_v4 = vpack.c.bf16 %v172_v63, %v160_v59  ;;  %v628_v9 = vpack.c.bf16 %v787_v26, %v783_v25  ;;  %v630_v10 = vpack.c.bf16 %v803_v36, %v801_v35 }
  0x24   :  { %126 = vmatmul.mubr.f32.vlgmr.msra.gmra.mrb[0].mxu1 %v125_v62  ;;  %v178_v5 = vand.u32 4294901760, %v177_v2 }
  0x25   :  { %619 = vmatpush1.bf16.msra.mxu1 %v618_v58  ;;  %236 = vmatprep.mubr.f32.mxu1 %v726_v0 }
  0x26   :  { %621 = vmatprep.subr.bf16.mxu1 %v620_v4  ;;  %647 = vmatpush1.bf16.msra.mxu0 %v646_v3  ;;  %v622_v7 = vpack.c.bf16 %v178_v5, %v166_v1 }
  0x27   :  { %649 = vmatprep.subr.bf16.mxu0 %v766_v17 }
  0x29   :  { %623 = vmatpush1.bf16.msra.mxu1 %v622_v7  ;;  %505 = vmatmul.mubr.f32.vlgmr.msra.gmra.mrb[0].mxu0 %v792_v30 }
  0x2a   :  { %625 = vmatprep.subr.bf16.mxu1 %v624_v6  ;;  %651 = vmatpush1.bf16.msra.mxu0 %v777_v22 }
  0x2b   :  { %653 = vmatprep.subr.bf16.mxu0 %v781_v24  ;;  %583 = vmatprep.mubr.f32.mxu0 %v726_v0 }
  0x2c   :  { %238 = vmatmul.mubr.f32.vlgmr.msra.gmra.mrb[0].mxu1 %v792_v30 }
  0x2d   :  { %627 = vmatpush1.bf16.msra.mxu1 %v626_v8  ;;  %324 = vmatprep.mubr.f32.mxu1 %v726_v0 }
  0x2e   :  { %629 = vmatprep.subr.bf16.mxu1 %v628_v9  ;;  %655 = vmatpush1.bf16.msra.mxu0 %v799_v34 }
  0x31   :  { %631 = vmatpush1.bf16.msra.mxu1 %v630_v10  ;;  %585 = vmatmul.mubr.f32.vlgmr.msra.gmra.mrb[0].mxu0 %v792_v30 }
  0x34   :  { %327 = vmatmul.mubr.f32.vlgmr.msra.gmra.mrb[0].mxu1 %v122_v38 }
  0x97   :  { %v42_v12 = vpop.permute.xlu0 %41 }
 0x104   :  { %v586_v11 = vpop.f32.mrb[0].mxu0 }
 0x105   :  { %v588_v13 = vpop.f32.mrb[1].mxu0 }
 0x107   :  { %v328_v14 = vpop.f32.mrb[0].mxu1 }
 0x108   :  { %v656_v15 = vadd.f32 %v328_v14, %v42_v12  ;;  %v330_v16 = vpop.f32.mrb[1].mxu1 }
 0x109   :  { %v658_v17 = vadd.f32 %v330_v16, %v42_v12 }
 0x10a   :  { %v657_v18 = vadd.f32 %v656_v15, %v586_v11 }
 0x10b   :  { %v659_v19 = vadd.f32 %v658_v17, %v588_v13 }
 0x10c   :  { %591 = vst [vmem:[#allocation5] sm:$0xff] %v657_v18 }
 0x10d   :  { %592 = vst [vmem:[#allocation5 + $0x8] sm:$0xff] %v659_v19 }
 0x10e   :  { %708 = shalt.err (!%p705_p12)
}
 0x10f   :  { %s709_s5 = scalar_lea.hbm %s855_s3, 256 }
 0x110   :  { %p710_p13 = scmp.ne.s32.totalorder %s855_s3, %s709_s5  ;;  %p713_p0 = scmp.lt.u32.totalorder %s709_s5, %s855_s3 }
 0x112   :  { %p715_p1 = pnand %p713_p0, %p710_p13 }
 0x114   :  { %718 = shalt.err (!%p715_p1)
}
 0x115   :  { %602 = dma.vmem_to_hbm [thread:$0]  %s600_s2, 256, %s855_s3, [#allocation4]  }
 0x116   :  { %721 = dma.done.wait [#allocation4], 256  }
 0x117   :  { %722 = vsyncadd [#allocation4], 4294967040 }
 0x118   :  { %606 = vsyncpa [#allocation3], 1 }
 0x119   :  { %607 = vsyncpa [#allocation4], 1 }

</bundles_post_ra>
